<compile_context>
chip_gen: v5e
topology: v5e:2x2
jax: 0.10.0
libtpu: 0.0.40
codegen_flags: <defaults>
</compile_context>

<pallas_src>
import jax
import jax.numpy as jnp
from jax.experimental import pallas as pl
from jax.experimental.pallas import tpu as pltpu


def _round_up(x, m):
    return ((x + m - 1) // m) * m


def _critic_kernel(s_ref, a_ref, w1s_ref, w1a_ref, b1_ref,
                   w2_ref, b2_ref, w3_ref, b3_ref, o_ref):
    # Streaming row tiles may arrive as bf16 (halved HBM traffic on v6e/v7x);
    # all math is done in f32 (no-op cast when inputs are already f32).
    s = s_ref[...].astype(jnp.float32)
    a = a_ref[...].astype(jnp.float32)

    # Fused "concat + first linear": two small-K dots avoid materializing
    # cat([s, a]) in HBM.
    # TODO(synk): copy s/a into one (TB, S+A) VMEM scratch and use a single dot
    # against the fused [S+A, H1] w1 (halves layer-1 MXU weight-push passes);
    # skipped since layer 1 is not the bottleneck and the unaligned lane-offset
    # store adds lowering risk.
    h1 = (jnp.dot(s, w1s_ref[...], preferred_element_type=jnp.float32)
          + jnp.dot(a, w1a_ref[...], preferred_element_type=jnp.float32)
          + b1_ref[...])
    h1 = jnp.maximum(h1, 0.0)

    h2 = jnp.dot(h1, w2_ref[...], preferred_element_type=jnp.float32) + b2_ref[...]
    h2 = jnp.maximum(h2, 0.0)

    # N=1 output head: VPU multiply + lane reduce (XLU) instead of an MXU
    # matmul with a single valid output lane.  w3_ref is [1, H2] (PyTorch layout).
    # TODO(synk): a lane-dense (1, TB) output block would replace TB/8 masked
    # vst.msk stores with a few unmasked vsts, but needs a sublane->lane
    # relayout of q in-kernel; output bytes are tiny, so it is left out here.
    q = jnp.sum(h2 * w3_ref[...], axis=-1, keepdims=True) + b3_ref[...]
    o_ref[...] = q.astype(o_ref.dtype)


def critic_forward(states, actions, params, *, batch_tile=4096,
                   input_dtype=None, min_grid_steps=2):
    """states: [B, S], actions: [B, A]  ->  q: [B, 1] (float32).

    batch_tile:     upper bound on rows per grid step (rounded to multiple of 8).
    input_dtype:    optional storage dtype for the streaming states/actions
                    tiles (e.g. jnp.bfloat16 on v6e/v7x); math stays f32.
    min_grid_steps: keep at least this many grid steps once B is large enough
                    so both v7x TensorCores get work on the "parallel" axis.
    """
    w1s, w1a, b1, w2, b2, w3, b3 = params
    B, S = states.shape
    A = actions.shape[1]
    H1 = w1s.shape[1]
    H2 = w2.shape[1]

    # Zero-pad hidden widths to lane multiples (128).  Exact: padded hidden
    # units have zero weights/bias, stay 0 through ReLU and contribute 0.
    H1p = _round_up(H1, 128)
    H2p = _round_up(H2, 128)
    if H1p != H1:
        w1s = jnp.pad(w1s, ((0, 0), (0, H1p - H1)))
        w1a = jnp.pad(w1a, ((0, 0), (0, H1p - H1)))
        b1 = jnp.pad(b1, ((0, 0), (0, H1p - H1)))
        w2 = jnp.pad(w2, ((0, H1p - H1), (0, 0)))
    if H2p != H2:
        w2 = jnp.pad(w2, ((0, 0), (0, H2p - H2)))
        b2 = jnp.pad(b2, ((0, 0), (0, H2p - H2)))
        w3 = jnp.pad(w3, ((0, 0), (0, H2p - H2)))

    # Optional reduced-precision storage for the only large (streaming) operands.
    if input_dtype is not None:
        states = states.astype(input_dtype)
        actions = actions.astype(input_dtype)

    # Batch tile: as large as possible to amortize per-grid-step overhead, but
    # capped so the grid keeps >= min_grid_steps steps (v7x megacore), and a
    # multiple of 8 (sublane granularity).  Last tile may be ragged.
    TB = min(_round_up(batch_tile, 8),
             _round_up(max(pl.cdiv(B, min_grid_steps), 8), 8))
    grid = (pl.cdiv(B, TB),)   # ragged last tile; no host-side jnp.pad.

    def row_spec(feat):
        # Row-tiled over the batch grid axis.
        return pl.BlockSpec((TB, feat), lambda i: (i, 0))

    def resident_spec(shape):
        # Full array, same block index every step -> stays resident in VMEM.
        # TODO(synk): pipeline_mode=pl.Buffered(1) to single-buffer these if
        # H1/H2 ever grow to the 1-2K range (double-buffering constant blocks
        # wastes VMEM for zero benefit).
        return pl.BlockSpec(shape, lambda i: (0, 0))

    # Explicit VMEM budget: future-proofs larger TB / hidden sizes against the
    # 16 MiB (v5e) / 32 MiB (v6e, v7x) scoped-VMEM defaults.
    in_itemsize = states.dtype.itemsize
    weight_bytes = sum(int(x.size) * x.dtype.itemsize
                       for x in (w1s, w1a, b1, w2, b2, w3, b3))
    vmem_budget = (2 * TB * (S + A) * in_itemsize   # double-buffered input tiles
                   + 2 * TB * 4                     # double-buffered output tile
                   + 2 * weight_bytes)              # resident params (2 bufs)
    vmem_limit = int(min(max(2 * vmem_budget + (2 << 20), 16 << 20), 48 << 20))

    out = pl.pallas_call(
        _critic_kernel,
        out_shape=jax.ShapeDtypeStruct((B, 1), jnp.float32),
        grid=grid,
        in_specs=[
            row_spec(S),                 # states tile   [TB, S]
            row_spec(A),                 # actions tile  [TB, A]
            resident_spec(w1s.shape),    # [S, H1p]
            resident_spec(w1a.shape),    # [A, H1p]
            resident_spec(b1.shape),     # [1, H1p]
            resident_spec(w2.shape),     # [H1p, H2p]
            resident_spec(b2.shape),     # [1, H2p]
            resident_spec(w3.shape),     # [1, H2p]
            resident_spec(b3.shape),     # [1, 1]
        ],
        out_specs=row_spec(1),           # q tile [TB, 1]
        compiler_params=pltpu.CompilerParams(
            dimension_semantics=("parallel",),
            vmem_limit_bytes=vmem_limit),
    )(states, actions, w1s, w1a, b1, w2, b2, w3, b3)
    return out


def init_critic_params(key, states_dim, actions_dim, hidden_size_1, hidden_size_2):
    """Deterministic init mirroring nn.Linear's U(-1/sqrt(fan_in), 1/sqrt(fan_in)).

    w1 is initialized as a single [S+A, H1] matrix (matching the fused PyTorch
    layer) and then split into (w1_s, w1_a) for the concat-free kernel.
    w3 is kept in PyTorch's native [1, H2] layout (row for the VPU-reduction
    output head).  Biases are [1, out] for clean broadcasting.
    """
    S, A, H1, H2 = states_dim, actions_dim, hidden_size_1, hidden_size_2

    def linear_init(k, fan_in, fan_out):
        kw, kb = jax.random.split(k)
        bound = 1.0 / jnp.sqrt(jnp.float32(fan_in))
        w = jax.random.uniform(kw, (fan_in, fan_out), jnp.float32, -bound, bound)
        b = jax.random.uniform(kb, (1, fan_out), jnp.float32, -bound, bound)
        return w, b

    w1, b1 = linear_init(jax.random.fold_in(key, 0), S + A, H1)
    w2, b2 = linear_init(jax.random.fold_in(key, 1), H1, H2)
    w3t, b3 = linear_init(jax.random.fold_in(key, 2), H2, 1)   # [H2, 1]

    w1s, w1a = w1[:S], w1[S:]
    w3 = w3t.T                                                  # [1, H2]
    return (w1s, w1a, b1, w2, b2, w3, b3)


def critic_reference(states, actions, params):
    """Pure-JAX reference with identical math to the PyTorch module."""
    w1s, w1a, b1, w2, b2, w3, b3 = params
    w1 = jnp.concatenate([w1s, w1a], axis=0)
    x = jnp.concatenate([states, actions], axis=1)
    h1 = jnp.maximum(x @ w1 + b1, 0.0)
    h2 = jnp.maximum(h1 @ w2 + b2, 0.0)
    return h2 @ w3.T + b3


if __name__ == "__main__":
    key = jax.random.PRNGKey(0)
    B, S, A, H1, H2 = 8, 12, 4, 32, 32

    k_s, k_a, k_p = jax.random.split(key, 3)
    states = jax.random.normal(k_s, (B, S), jnp.float32)
    actions = jax.random.normal(k_a, (B, A), jnp.float32)
    params = init_critic_params(k_p, S, A, H1, H2)

    # 1) f32 path (default): must match the reference tightly.
    q = jax.block_until_ready(critic_forward(states, actions, params))
    q_ref = critic_reference(states, actions, params)
    assert q.shape == (B, 1), q.shape
    assert jnp.allclose(q, q_ref, atol=1e-5, rtol=1e-5), (q, q_ref)

    # 2) Multi-step ragged-tile path (no host padding): B not a multiple of the
    #    tile, >= 2 "parallel" grid steps.
    B2 = 20
    k_s2, k_a2 = jax.random.split(jax.random.fold_in(key, 7))
    states2 = jax.random.normal(k_s2, (B2, S), jnp.float32)
    actions2 = jax.random.normal(k_a2, (B2, A), jnp.float32)
    q2 = jax.block_until_ready(
        critic_forward(states2, actions2, params, batch_tile=16))
    q2_ref = critic_reference(states2, actions2, params)
    assert q2.shape == (B2, 1), q2.shape
    assert jnp.allclose(q2, q2_ref, atol=1e-5, rtol=1e-5), (q2, q2_ref)

    # 3) Gated bf16-input storage path (v6e/v7x DMA saving); compare against
    #    the reference evaluated on the same quantized inputs.
    q_bf16 = jax.block_until_ready(
        critic_forward(states, actions, params, input_dtype=jnp.bfloat16))
    s_q = states.astype(jnp.bfloat16).astype(jnp.float32)
    a_q = actions.astype(jnp.bfloat16).astype(jnp.float32)
    q_bf16_ref = critic_reference(s_q, a_q, params)
    assert jnp.allclose(q_bf16, q_bf16_ref, atol=1e-3, rtol=1e-3), (q_bf16, q_bf16_ref)

    print("KERNEL_OK")
</pallas_src>

<mosaic_0001>
module attributes {stable_mosaic.version = 11 : i64} {
  func.func @_critic_kernel(%arg0: i32, %arg1: memref<8x12xf32, #tpu.memory_space<vmem>>, %arg2: memref<8x4xf32, #tpu.memory_space<vmem>>, %arg3: memref<12x128xf32, #tpu.memory_space<vmem>>, %arg4: memref<4x128xf32, #tpu.memory_space<vmem>>, %arg5: memref<1x128xf32, #tpu.memory_space<vmem>>, %arg6: memref<128x128xf32, #tpu.memory_space<vmem>>, %arg7: memref<1x128xf32, #tpu.memory_space<vmem>>, %arg8: memref<1x128xf32, #tpu.memory_space<vmem>>, %arg9: memref<1x1xf32, #tpu.memory_space<vmem>>, %arg10: memref<8x1xf32, #tpu.memory_space<vmem>>) attributes {dimension_semantics = [#tpu.dimension_semantics<parallel>], iteration_bounds = array<i64: 1>, scalar_prefetch = 0 : i64, scratch_operands = 0 : i64, tpu.core_type = #tpu.core_type<tc>, window_params = [{transform_indices = @transform_0, window_bounds = array<i64: 8, 12>}, {transform_indices = @transform_1, window_bounds = array<i64: 8, 4>}, {pipeline_mode = #tpu.pipeline_mode<synchronous>, transform_indices = @transform_2, window_bounds = array<i64: 12, 128>}, {pipeline_mode = #tpu.pipeline_mode<synchronous>, transform_indices = @transform_3, window_bounds = array<i64: 4, 128>}, {pipeline_mode = #tpu.pipeline_mode<synchronous>, transform_indices = @transform_4, window_bounds = array<i64: 1, 128>}, {pipeline_mode = #tpu.pipeline_mode<synchronous>, transform_indices = @transform_5, window_bounds = array<i64: 128, 128>}, {pipeline_mode = #tpu.pipeline_mode<synchronous>, transform_indices = @transform_6, window_bounds = array<i64: 1, 128>}, {pipeline_mode = #tpu.pipeline_mode<synchronous>, transform_indices = @transform_7, window_bounds = array<i64: 1, 128>}, {pipeline_mode = #tpu.pipeline_mode<synchronous>, transform_indices = @transform_8, window_bounds = array<i64: 1, 1>}, {transform_indices = @transform_9, window_bounds = array<i64: 8, 1>}]} {
    %c0 = arith.constant 0 : index
    %c0_0 = arith.constant 0 : index
    %0 = vector.load %arg1[%c0, %c0_0] : memref<8x12xf32, #tpu.memory_space<vmem>>, vector<8x12xf32>
    %c0_1 = arith.constant 0 : index
    %c0_2 = arith.constant 0 : index
    %1 = vector.load %arg2[%c0_1, %c0_2] : memref<8x4xf32, #tpu.memory_space<vmem>>, vector<8x4xf32>
    %c0_3 = arith.constant 0 : index
    %c0_4 = arith.constant 0 : index
    %2 = vector.load %arg3[%c0_3, %c0_4] : memref<12x128xf32, #tpu.memory_space<vmem>>, vector<12x128xf32>
    %cst = arith.constant dense<0.000000e+00> : vector<8x128xf32>
    %3 = tpu.matmul %0, %2, %cst {dimension_numbers = #tpu.dot_dimension_numbers<[1], [0], [0], [1], [0, 0, 1, 1], [], []>} : vector<8x12xf32>, vector<12x128xf32>, vector<8x128xf32> -> vector<8x128xf32>
    %c0_5 = arith.constant 0 : index
    %c0_6 = arith.constant 0 : index
    %4 = vector.load %arg4[%c0_5, %c0_6] : memref<4x128xf32, #tpu.memory_space<vmem>>, vector<4x128xf32>
    %cst_7 = arith.constant dense<0.000000e+00> : vector<8x128xf32>
    %5 = tpu.matmul %1, %4, %cst_7 {dimension_numbers = #tpu.dot_dimension_numbers<[1], [0], [0], [1], [0, 0, 1, 1], [], []>} : vector<8x4xf32>, vector<4x128xf32>, vector<8x128xf32> -> vector<8x128xf32>
    %6 = arith.addf %3, %5 : vector<8x128xf32>
    %c0_8 = arith.constant 0 : index
    %c0_9 = arith.constant 0 : index
    %7 = vector.load %arg5[%c0_8, %c0_9] : memref<1x128xf32, #tpu.memory_space<vmem>>, vector<1x128xf32>
    %8 = vector.broadcast %7 : vector<1x128xf32> to vector<8x128xf32>
    %9 = arith.addf %6, %8 : vector<8x128xf32>
    %cst_10 = arith.constant 0.000000e+00 : f32
    %10 = vector.broadcast %cst_10 : f32 to vector<8x128xf32>
    %11 = arith.maximumf %9, %10 : vector<8x128xf32>
    %c0_11 = arith.constant 0 : index
    %c0_12 = arith.constant 0 : index
    %12 = vector.load %arg6[%c0_11, %c0_12] : memref<128x128xf32, #tpu.memory_space<vmem>>, vector<128x128xf32>
    %cst_13 = arith.constant dense<0.000000e+00> : vector<8x128xf32>
    %13 = tpu.matmul %11, %12, %cst_13 {dimension_numbers = #tpu.dot_dimension_numbers<[1], [0], [0], [1], [0, 0, 1, 1], [], []>} : vector<8x128xf32>, vector<128x128xf32>, vector<8x128xf32> -> vector<8x128xf32>
    %c0_14 = arith.constant 0 : index
    %c0_15 = arith.constant 0 : index
    %14 = vector.load %arg7[%c0_14, %c0_15] : memref<1x128xf32, #tpu.memory_space<vmem>>, vector<1x128xf32>
    %15 = vector.broadcast %14 : vector<1x128xf32> to vector<8x128xf32>
    %16 = arith.addf %13, %15 : vector<8x128xf32>
    %cst_16 = arith.constant 0.000000e+00 : f32
    %17 = vector.broadcast %cst_16 : f32 to vector<8x128xf32>
    %18 = arith.maximumf %16, %17 : vector<8x128xf32>
    %c0_17 = arith.constant 0 : index
    %c0_18 = arith.constant 0 : index
    %19 = vector.load %arg8[%c0_17, %c0_18] : memref<1x128xf32, #tpu.memory_space<vmem>>, vector<1x128xf32>
    %20 = vector.broadcast %19 : vector<1x128xf32> to vector<8x128xf32>
    %21 = arith.mulf %18, %20 : vector<8x128xf32>
    %cst_19 = arith.constant dense<0.000000e+00> : vector<8xf32>
    %22 = vector.multi_reduction <add>, %21, %cst_19 [1] : vector<8x128xf32> to vector<8xf32>
    %23 = vector.shape_cast %22 : vector<8xf32> to vector<8x1xf32>
    %c0_20 = arith.constant 0 : index
    %c0_21 = arith.constant 0 : index
    %24 = vector.load %arg9[%c0_20, %c0_21] : memref<1x1xf32, #tpu.memory_space<vmem>>, vector<1x1xf32>
    %25 = vector.broadcast %24 : vector<1x1xf32> to vector<8x1xf32>
    %26 = arith.addf %23, %25 : vector<8x1xf32>
    %c0_22 = arith.constant 0 : index
    %c0_23 = arith.constant 0 : index
    %27 = vector.load %arg10[%c0_22, %c0_23] : memref<8x1xf32, #tpu.memory_space<vmem>>, vector<8x1xf32>
    tpu.vector_store %arg10[%c0_22, %c0_23], %26 {strides = array<i32>} : memref<8x1xf32, #tpu.memory_space<vmem>>, vector<8x1xf32>,
    return
  }
  func.func @transform_0(%arg0: i32) -> (i32, i32) {
    %c0_i32 = arith.constant 0 : i32
    %c0_i32_0 = arith.constant 0 : i32
    return %arg0, %c0_i32 : i32, i32
  }
  func.func @transform_1(%arg0: i32) -> (i32, i32) {
    %c0_i32 = arith.constant 0 : i32
    %c0_i32_0 = arith.constant 0 : i32
    return %arg0, %c0_i32 : i32, i32
  }
  func.func @transform_2(%arg0: i32) -> (i32, i32) {
    %c0_i32 = arith.constant 0 : i32
    %c0_i32_0 = arith.constant 0 : i32
    %c0_i32_1 = arith.constant 0 : i32
    return %c0_i32, %c0_i32_0 : i32, i32
  }
  func.func @transform_3(%arg0: i32) -> (i32, i32) {
    %c0_i32 = arith.constant 0 : i32
    %c0_i32_0 = arith.constant 0 : i32
    %c0_i32_1 = arith.constant 0 : i32
    return %c0_i32, %c0_i32_0 : i32, i32
  }
  func.func @transform_4(%arg0: i32) -> (i32, i32) {
    %c0_i32 = arith.constant 0 : i32
    %c0_i32_0 = arith.constant 0 : i32
    %c0_i32_1 = arith.constant 0 : i32
    return %c0_i32, %c0_i32_0 : i32, i32
  }
  func.func @transform_5(%arg0: i32) -> (i32, i32) {
    %c0_i32 = arith.constant 0 : i32
    %c0_i32_0 = arith.constant 0 : i32
    %c0_i32_1 = arith.constant 0 : i32
    return %c0_i32, %c0_i32_0 : i32, i32
  }
  func.func @transform_6(%arg0: i32) -> (i32, i32) {
    %c0_i32 = arith.constant 0 : i32
    %c0_i32_0 = arith.constant 0 : i32
    %c0_i32_1 = arith.constant 0 : i32
    return %c0_i32, %c0_i32_0 : i32, i32
  }
  func.func @transform_7(%arg0: i32) -> (i32, i32) {
    %c0_i32 = arith.constant 0 : i32
    %c0_i32_0 = arith.constant 0 : i32
    %c0_i32_1 = arith.constant 0 : i32
    return %c0_i32, %c0_i32_0 : i32, i32
  }
  func.func @transform_8(%arg0: i32) -> (i32, i32) {
    %c0_i32 = arith.constant 0 : i32
    %c0_i32_0 = arith.constant 0 : i32
    %c0_i32_1 = arith.constant 0 : i32
    return %c0_i32, %c0_i32_0 : i32, i32
  }
  func.func @transform_9(%arg0: i32) -> (i32, i32) {
    %c0_i32 = arith.constant 0 : i32
    %c0_i32_0 = arith.constant 0 : i32
    return %arg0, %c0_i32 : i32, i32
  }
}

</mosaic_0001>

<bundles_post_ra>
// kernel: tpu_custom_call.1
= control target key start
LH: loop header
LB: loop body
LE: loop exit
PB: predicated region body
PF: predicated region fallthrough
CT: control target
= control target key end

     0   :  { %s341_s0 = inlined_call_operand.vmem [shape: f32[8,12], index: 0, kind: input, shape index: {}]   ;;  %s342_s1 = inlined_call_operand.vmem [shape: f32[8,4], index: 1, kind: input, shape index: {}]   ;;  %s343_s2 = inlined_call_operand.hbm [shape: f32[12,128], index: 2, kind: input, shape index: {}]   ;;  %s344_s3 = inlined_call_operand.vmem [shape: f32[4,128], index: 3, kind: input, shape index: {}]   ;;  %s345_s4 = inlined_call_operand.vmem [shape: f32[1,128], index: 4, kind: input, shape index: {}]   ;;  %s346_s5 = inlined_call_operand.hbm [shape: f32[128,128], index: 5, kind: input, shape index: {}]   ;;  %s347_s6 = inlined_call_operand.vmem [shape: f32[1,128], index: 6, kind: input, shape index: {}]   ;;  %s348_s7 = inlined_call_operand.vmem [shape: f32[1,128], index: 7, kind: input, shape index: {}]   ;;  %s349_s8 = inlined_call_operand.<no memory space> [shape: f32[1,1], index: 8, kind: input, shape index: {}]   ;;  %s350_s9 = inlined_call_operand.vmem [shape: f32[8,1], index: 9, kind: output, shape index: {}]  }
   0x1   :  { %v14_v0 = vstv %s349_s8 }
   0x2   :  { %15 = vst [vmem:[#allocation2] sm:$0x1] %v14_v0 }
   0x3   :  { %16 = vsyncpa [#allocation4], 0  ;;  %s26_s13 = sshll.u32 %s343_s2, 4  ;;  %s27_s13 = int_to_ptr.hbm [resolvable:$true] %s26_s13 }
   0x4   :  { %17 = vsyncpa [#allocation6], 0  ;;  %s257_s14 = smov [#allocation3]   ;;  %s43_s18 = sshll.u32 %s346_s5, 4  ;;  %s44_s18 = int_to_ptr.hbm [resolvable:$true] %s43_s18 }
   0x5   :  { %s28_s15 = sshll.u32 %s257_s14, 4  ;;  %s258_s19 = smov 128   ;;  %s29_s15 = int_to_ptr.vmem [resolvable:$true] %s28_s15 }
   0x6   :  { %s259_s20 = smov 8   ;;  %s260_s8 = smov [#allocation5]  }
   0x7   :  { %34 = dma.hbm_to_vmem [thread:$0]  %s27_s13, 256, %s29_s15, [#allocation4], %s258_s19, %s258_s19, %s259_s20  }
   0x8   :  { %s45_s21 = sshll.u32 %s260_s8, 4  ;;  %s46_s21 = int_to_ptr.vmem [resolvable:$true] %s45_s21 }
   0x9   :  { %51 = dma.hbm_to_vmem [thread:$0]  %s44_s18, 2048, %s46_s21, [#allocation6], %s258_s19, %s258_s19, %s259_s20  }
   0xa   :  { %253 = dma.done.wait [#allocation4], 256  }
   0xb   :  { %254 = vsyncadd [#allocation4], 4294967040 }
   0xc   :  { %255 = dma.done.wait [#allocation6], 2048  }
   0xd   :  { %256 = vsyncadd [#allocation6], 4294965248  ;;  %vm75_vm0 = vcmask 1043456   ;;  %vm71_vm1 = vcmask 31744   ;;  %v69_v1 = vld [vmem:[#allocation3 + $0x8] sm:$0xf] }
   0xe   :  { %v70_v2 = vld [vmem:[%s344_s3] sm:$0xf]  ;;  %195 = vmatpush.msk.msra.mxu1 %vm75_vm0, %v69_v1  ;;  %vm99_vm2 = vcmask 97280   ;;  %v147_v6 = vld [vmem:[#allocation5 + $0x78] sm:$0xff]  ;;  %v144_v9 = vld [vmem:[#allocation5 + $0x60] sm:$0xff]  ;;  %vm185_vm3 = vcmask 7168  }
   0xf   :  { %v68_v3 = vld [vmem:[#allocation3] sm:$0xff]  ;;  %193 = vmatpush.msk.msra.mxu0 %vm75_vm0, %v70_v2  ;;  %152 = vmatpush.msra.mxu2 %v147_v6  ;;  %v145_v8 = vld [vmem:[#allocation5 + $0x68] sm:$0xff]  ;;  %v143_v10 = vld [vmem:[#allocation5 + $0x58] sm:$0xff] }
  0x10   :  { %v67_v4 = vld [vmem:[%s342_s1] sm:$0xff]  ;;  %121 = vmatpush.msra.mxu1 %v68_v3  ;;  %v140_v13 = vld [vmem:[#allocation5 + $0x40] sm:$0xff]  ;;  %v139_v14 = vld [vmem:[#allocation5 + $0x38] sm:$0xff] }
  0x11   :  { %v66_v5 = vld [vmem:[%s341_s0] sm:$0xff]  ;;  %194 = vmatmul.msk.f32.vlgmr.msra.gmra.mxu0 %vm71_vm1, %v67_v4  ;;  %v136_v17 = vld [vmem:[#allocation5 + $0x20] sm:$0xff]  ;;  %v135_v18 = vld [vmem:[#allocation5 + $0x18] sm:$0xff] }
  0x12   :  { %v146_v7 = vld [vmem:[#allocation5 + $0x70] sm:$0xff]  ;;  %196 = vmatmul.msk.f32.vlgmr.msra.gmra.mxu1 %vm99_vm2, %v66_v5  ;;  %v141_v12 = vld [vmem:[#allocation5 + $0x48] sm:$0xff]  ;;  %v132_v21 = vld [vmem:[#allocation5] sm:$0xff] }
  0x13   :  { %153 = vmatpush.msra.mxu2 %v146_v7  ;;  %v142_v11 = vld [vmem:[#allocation5 + $0x50] sm:$0xff]  ;;  %v137_v16 = vld [vmem:[#allocation5 + $0x28] sm:$0xff] }
  0x14   :  { %v138_v15 = vld [vmem:[#allocation5 + $0x30] sm:$0xff]  ;;  %v133_v20 = vld [vmem:[#allocation5 + $0x8] sm:$0xff] }
  0x15   :  { %154 = vmatpush.msra.mxu2 %v145_v8  ;;  %v134_v19 = vld [vmem:[#allocation5 + $0x10] sm:$0xff]  ;;  %v201_v23 = vld [vmem:[%s345_s4] ss:$0 sm:$0xff] }
  0x16   :  { %v202_v28 = vld [vmem:[%s347_s6] ss:$0 sm:$0xff] }
  0x17   :  { %155 = vmatpush.msra.mxu2 %v144_v9  ;;  %v203_v31 = vld [vmem:[%s348_s7] ss:$0 sm:$0xff] }
  0x18   :  { %v204_v34 = vld [vmem:[#allocation2] ss:$0 sm:$0xff] }
  0x19   :  { %156 = vmatpush.msra.mxu2 %v143_v10 }
  0x1b   :  { %157 = vmatpush.msra.mxu2 %v142_v11 }
  0x1d   :  { %158 = vmatpush.msra.mxu2 %v141_v12 }
  0x1f   :  { %159 = vmatpush.msra.mxu2 %v140_v13 }
  0x21   :  { %160 = vmatpush.msra.mxu2 %v139_v14 }
  0x23   :  { %161 = vmatpush.msra.mxu2 %v138_v15 }
  0x25   :  { %162 = vmatpush.msra.mxu2 %v137_v16 }
  0x27   :  { %163 = vmatpush.msra.mxu2 %v136_v17 }
  0x29   :  { %164 = vmatpush.msra.mxu2 %v135_v18 }
  0x2b   :  { %165 = vmatpush.msra.mxu2 %v134_v19 }
  0x2d   :  { %166 = vmatpush.msra.mxu2 %v133_v20 }
  0x2f   :  { %167 = vmatpush.msra.mxu2 %v132_v21 }
  0x8e   :  { %v96_v22 = vpop.f32.mrf.mxu0 }
  0x8f   :  { %v123_v24 = vpop.f32.mrf.mxu1 }
  0x90   :  { %v124_v25 = vadd.f32 %v123_v24, %v96_v22 }
  0x92   :  { %v130_v26 = vadd.f32 %v201_v23, %v124_v25 }
  0x94   :  { %v131_v27 = vmax.f32 %v130_v26, 0.0 }
  0x96   :  { %168 = vmatmul.f32.vlgmr.msra.gmra.mxu2 %v131_v27 }
 0x119   :  { %v169_v29 = vpop.f32.mrf.mxu2 }
 0x11a   :  { %v170_v30 = vadd.f32 %v202_v28, %v169_v29 }
 0x11c   :  { %v172_v32 = vmax.f32 %v170_v30, 0.0 }
 0x11e   :  { %v177_v33 = vmul.f32 %v203_v31, %v172_v32 }
 0x120   :  { %178 = vadd.xlane.f32.xlu0 %v177_v33 }
 0x193   :  { %v179_v35 = vpop.xlane.xlu0 %178 }
 0x194   :  { %v184_v36 = vadd.f32 %v204_v34, %v179_v35 }
 0x196   :  { %186 = vst.msk [vmem:[%s350_s9] sm:$0xff] %vm185_vm3, %v184_v36 }
 0x197   :  { %191 = vsyncpa [#allocation4], 1 }
 0x198   :  { %192 = vsyncpa [#allocation6], 1 }

</bundles_post_ra>
